<compile_context>
chip_gen: v6e
topology: v6e:2x2x1
jax: 0.10.0
libtpu: 0.0.40
codegen_flags: <defaults>
</compile_context>

<pallas_src>
import jax
import jax.numpy as jnp
from jax.experimental import pallas as pl
from jax.experimental.pallas import tpu as pltpu


def _mlp_kernel(x_ref, w1_ref, b1_ref, w2_ref, b2_ref, wd_ref, bd_ref, out_ref):
    """One batch tile of the forward pass; all weights are VMEM-resident."""
    # Hoist bias loads/broadcasts once.
    b1 = b1_ref[...]
    b2 = b2_ref[...]
    bd = bd_ref[...]

    x = x_ref[...]

    # hidden layer 1: Linear + Sigmoid
    h = jnp.dot(x, w1_ref[...], preferred_element_type=jnp.float32) + b1
    h = jax.nn.sigmoid(h)

    # hidden layer 2: Linear + Sigmoid
    h = jnp.dot(h, w2_ref[...], preferred_element_type=jnp.float32) + b2
    h = jax.nn.sigmoid(h)

    # 2-class head folded into a single logit difference -> sigmoid
    d = jnp.dot(h, wd_ref[...], preferred_element_type=jnp.float32) + bd  # [tb, 1]
    p1 = jax.nn.sigmoid(d)                                                # P(class 1)

    # Assemble [tb, 2] = [1 - p1, p1] with a single dense store.
    tb, nc = out_ref.shape
    col = jax.lax.broadcasted_iota(jnp.int32, (tb, nc), 1)
    out_ref[...] = jnp.where(col == 1, p1, 1.0 - p1)


def logistic_model_forward(x, params, *, block_batch=512):
    """x: [batch, input_dim] float32. params: dict of weights/biases (see init_params)."""
    batch, input_dim = x.shape
    h1 = params["w1"].shape[1]
    h2 = params["w2"].shape[1]
    num_classes = params["w3"].shape[1]  # == 2

    # Fold the 2-class output layer into a single logit-difference column
    # (done once on the host/XLA side, outside the kernel).
    w_diff = params["w3"][:, 1:2] - params["w3"][:, 0:1]   # [h2, 1]
    b_diff = params["b3"][:, 1:2] - params["b3"][:, 0:1]   # [1, 1]

    # Pick the batch tile: as large as is sensible, padded to a multiple of 8.
    tb = min(block_batch, batch)
    padded = pl.cdiv(batch, tb) * tb
    x_in = x
    if padded != batch:
        x_in = jnp.pad(x, ((0, padded - batch), (0, 0)))
    grid = (padded // tb,)

    weight_elems = (input_dim * h1 + h1 + h1 * h2 + h2 + h2 + 1)
    cost = pl.CostEstimate(
        flops=2 * batch * (input_dim * h1 + h1 * h2 + h2),
        transcendentals=batch * (h1 + h2 + 1),
        bytes_accessed=4 * (batch * (input_dim + num_classes) + weight_elems),
    )

    out = pl.pallas_call(
        _mlp_kernel,
        out_shape=jax.ShapeDtypeStruct((padded, num_classes), jnp.float32),
        grid=grid,
        in_specs=[
            pl.BlockSpec((tb, input_dim), lambda i: (i, 0)),   # x tile (pipelined)
            pl.BlockSpec((input_dim, h1), lambda i: (0, 0)),   # w1 (resident)
            pl.BlockSpec((1, h1),         lambda i: (0, 0)),   # b1
            pl.BlockSpec((h1, h2),        lambda i: (0, 0)),   # w2
            pl.BlockSpec((1, h2),         lambda i: (0, 0)),   # b2
            pl.BlockSpec((h2, 1),         lambda i: (0, 0)),   # w_diff
            pl.BlockSpec((1, 1),          lambda i: (0, 0)),   # b_diff
        ],
        out_specs=pl.BlockSpec((tb, num_classes), lambda i: (i, 0)),
        compiler_params=pltpu.CompilerParams(
            dimension_semantics=("parallel",),   # shard batch across TCs on v7x
        ),
        cost_estimate=cost,
    )(x_in, params["w1"], params["b1"], params["w2"], params["b2"], w_diff, b_diff)

    if padded != batch:
        out = out[:batch]
    return out


def init_params(key, input_dim, hidden_sizes, num_classes=2):
    """Deterministic synthetic init mimicking nn.Linear shapes (stored transposed)."""
    dims = [input_dim] + list(hidden_sizes) + [num_classes]
    params = {}
    for i in range(len(dims) - 1):
        key, kw, kb = jax.random.split(key, 3)
        fan_in, fan_out = dims[i], dims[i + 1]
        bound = 1.0 / jnp.sqrt(fan_in)
        params[f"w{i+1}"] = jax.random.uniform(
            kw, (fan_in, fan_out), jnp.float32, -bound, bound)
        params[f"b{i+1}"] = jax.random.uniform(
            kb, (1, fan_out), jnp.float32, -bound, bound)
    return params


def _reference_forward(x, params):
    """Pure-JAX reference matching the PyTorch module (softmax head)."""
    h = jax.nn.sigmoid(x @ params["w1"] + params["b1"])
    h = jax.nn.sigmoid(h @ params["w2"] + params["b2"])
    logits = h @ params["w3"] + params["b3"]
    return jax.nn.softmax(logits, axis=1)


if __name__ == "__main__":
    # Small shapes consistent with the module: batch=8, input_dim=32, hidden_sizes=[32, 16]
    batch, input_dim = 8, 32
    hidden_sizes = [32, 16]

    key = jax.random.PRNGKey(0)
    key, kx = jax.random.split(key)
    x = jax.random.normal(kx, (batch, input_dim), dtype=jnp.float32)

    params = init_params(key, input_dim, hidden_sizes, num_classes=2)

    out = logistic_model_forward(x, params)
    out = jax.block_until_ready(out)

    # sanity: shape, softmax rows sum to 1, matches pure-JAX reference
    assert out.shape == (batch, 2)
    assert jnp.allclose(jnp.sum(out, axis=1), 1.0, atol=1e-5)
    ref = _reference_forward(x, params)
    assert jnp.allclose(out, ref, atol=1e-5, rtol=1e-5)

    print("KERNEL_OK")
</pallas_src>

<mosaic_0001>
module attributes {stable_mosaic.version = 11 : i64} {
  func.func @_mlp_kernel(%arg0: i32, %arg1: memref<8x32xf32, #tpu.memory_space<vmem>>, %arg2: memref<32x32xf32, #tpu.memory_space<vmem>>, %arg3: memref<1x32xf32, #tpu.memory_space<vmem>>, %arg4: memref<32x16xf32, #tpu.memory_space<vmem>>, %arg5: memref<1x16xf32, #tpu.memory_space<vmem>>, %arg6: memref<16x1xf32, #tpu.memory_space<vmem>>, %arg7: memref<1x1xf32, #tpu.memory_space<vmem>>, %arg8: memref<8x2xf32, #tpu.memory_space<vmem>>) attributes {dimension_semantics = [#tpu.dimension_semantics<parallel>], iteration_bounds = array<i64: 1>, scalar_prefetch = 0 : i64, scratch_operands = 0 : i64, tpu.core_type = #tpu.core_type<tc>, window_params = [{transform_indices = @transform_0, window_bounds = array<i64: 8, 32>}, {pipeline_mode = #tpu.pipeline_mode<synchronous>, transform_indices = @transform_1, window_bounds = array<i64: 32, 32>}, {pipeline_mode = #tpu.pipeline_mode<synchronous>, transform_indices = @transform_2, window_bounds = array<i64: 1, 32>}, {pipeline_mode = #tpu.pipeline_mode<synchronous>, transform_indices = @transform_3, window_bounds = array<i64: 32, 16>}, {pipeline_mode = #tpu.pipeline_mode<synchronous>, transform_indices = @transform_4, window_bounds = array<i64: 1, 16>}, {pipeline_mode = #tpu.pipeline_mode<synchronous>, transform_indices = @transform_5, window_bounds = array<i64: 16, 1>}, {pipeline_mode = #tpu.pipeline_mode<synchronous>, transform_indices = @transform_6, window_bounds = array<i64: 1, 1>}, {transform_indices = @transform_7, window_bounds = array<i64: 8, 2>}]} {
    %c0 = arith.constant 0 : index
    %c0_0 = arith.constant 0 : index
    %0 = vector.load %arg3[%c0, %c0_0] : memref<1x32xf32, #tpu.memory_space<vmem>>, vector<1x32xf32>
    %c0_1 = arith.constant 0 : index
    %c0_2 = arith.constant 0 : index
    %1 = vector.load %arg5[%c0_1, %c0_2] : memref<1x16xf32, #tpu.memory_space<vmem>>, vector<1x16xf32>
    %c0_3 = arith.constant 0 : index
    %c0_4 = arith.constant 0 : index
    %2 = vector.load %arg7[%c0_3, %c0_4] : memref<1x1xf32, #tpu.memory_space<vmem>>, vector<1x1xf32>
    %c0_5 = arith.constant 0 : index
    %c0_6 = arith.constant 0 : index
    %3 = vector.load %arg1[%c0_5, %c0_6] : memref<8x32xf32, #tpu.memory_space<vmem>>, vector<8x32xf32>
    %c0_7 = arith.constant 0 : index
    %c0_8 = arith.constant 0 : index
    %4 = vector.load %arg2[%c0_7, %c0_8] : memref<32x32xf32, #tpu.memory_space<vmem>>, vector<32x32xf32>
    %cst = arith.constant dense<0.000000e+00> : vector<8x32xf32>
    %5 = tpu.matmul %3, %4, %cst {dimension_numbers = #tpu.dot_dimension_numbers<[1], [0], [0], [1], [0, 0, 1, 1], [], []>} : vector<8x32xf32>, vector<32x32xf32>, vector<8x32xf32> -> vector<8x32xf32>
    %6 = vector.broadcast %0 : vector<1x32xf32> to vector<8x32xf32>
    %7 = arith.addf %5, %6 : vector<8x32xf32>
    %8 = arith.negf %7 : vector<8x32xf32>
    %9 = math.exp %8 : vector<8x32xf32>
    %cst_9 = arith.constant 1.000000e+00 : f32
    %10 = vector.broadcast %cst_9 : f32 to vector<8x32xf32>
    %11 = arith.addf %10, %9 : vector<8x32xf32>
    %12 = arith.divf %10, %11 : vector<8x32xf32>
    %c0_10 = arith.constant 0 : index
    %c0_11 = arith.constant 0 : index
    %13 = vector.load %arg4[%c0_10, %c0_11] : memref<32x16xf32, #tpu.memory_space<vmem>>, vector<32x16xf32>
    %cst_12 = arith.constant dense<0.000000e+00> : vector<8x16xf32>
    %14 = tpu.matmul %12, %13, %cst_12 {dimension_numbers = #tpu.dot_dimension_numbers<[1], [0], [0], [1], [0, 0, 1, 1], [], []>} : vector<8x32xf32>, vector<32x16xf32>, vector<8x16xf32> -> vector<8x16xf32>
    %15 = vector.broadcast %1 : vector<1x16xf32> to vector<8x16xf32>
    %16 = arith.addf %14, %15 : vector<8x16xf32>
    %17 = arith.negf %16 : vector<8x16xf32>
    %18 = math.exp %17 : vector<8x16xf32>
    %cst_13 = arith.constant 1.000000e+00 : f32
    %19 = vector.broadcast %cst_13 : f32 to vector<8x16xf32>
    %20 = arith.addf %19, %18 : vector<8x16xf32>
    %21 = arith.divf %19, %20 : vector<8x16xf32>
    %c0_14 = arith.constant 0 : index
    %c0_15 = arith.constant 0 : index
    %22 = vector.load %arg6[%c0_14, %c0_15] : memref<16x1xf32, #tpu.memory_space<vmem>>, vector<16x1xf32>
    %cst_16 = arith.constant dense<0.000000e+00> : vector<8x1xf32>
    %23 = tpu.matmul %21, %22, %cst_16 {dimension_numbers = #tpu.dot_dimension_numbers<[1], [0], [0], [1], [0, 0, 1, 1], [], []>} : vector<8x16xf32>, vector<16x1xf32>, vector<8x1xf32> -> vector<8x1xf32>
    %24 = vector.broadcast %2 : vector<1x1xf32> to vector<8x1xf32>
    %25 = arith.addf %23, %24 : vector<8x1xf32>
    %26 = arith.negf %25 : vector<8x1xf32>
    %27 = math.exp %26 : vector<8x1xf32>
    %cst_17 = arith.constant 1.000000e+00 : f32
    %28 = vector.broadcast %cst_17 : f32 to vector<8x1xf32>
    %29 = arith.addf %28, %27 : vector<8x1xf32>
    %30 = arith.divf %28, %29 : vector<8x1xf32>
    %31 = tpu.iota {dimensions = array<i32: 1>} : vector<8x2xi32>
    %c1_i32 = arith.constant 1 : i32
    %32 = vector.broadcast %c1_i32 : i32 to vector<8x2xi32>
    %33 = arith.cmpi eq, %31, %32 : vector<8x2xi32>
    %cst_18 = arith.constant 1.000000e+00 : f32
    %34 = vector.broadcast %cst_18 : f32 to vector<8x1xf32>
    %35 = arith.subf %34, %30 : vector<8x1xf32>
    %36 = vector.shape_cast %30 : vector<8x1xf32> to vector<8x1xf32>
    %37 = vector.broadcast %36 : vector<8x1xf32> to vector<8x2xf32>
    %38 = vector.shape_cast %35 : vector<8x1xf32> to vector<8x1xf32>
    %39 = vector.broadcast %38 : vector<8x1xf32> to vector<8x2xf32>
    %40 = arith.select %33, %37, %39 : vector<8x2xi1>, vector<8x2xf32>
    %c0_19 = arith.constant 0 : index
    %c0_20 = arith.constant 0 : index
    %41 = vector.load %arg8[%c0_19, %c0_20] : memref<8x2xf32, #tpu.memory_space<vmem>>, vector<8x2xf32>
    tpu.vector_store %arg8[%c0_19, %c0_20], %40 {strides = array<i32>} : memref<8x2xf32, #tpu.memory_space<vmem>>, vector<8x2xf32>,
    return
  }
  func.func @transform_0(%arg0: i32) -> (i32, i32) {
    %c0_i32 = arith.constant 0 : i32
    %c0_i32_0 = arith.constant 0 : i32
    return %arg0, %c0_i32 : i32, i32
  }
  func.func @transform_1(%arg0: i32) -> (i32, i32) {
    %c0_i32 = arith.constant 0 : i32
    %c0_i32_0 = arith.constant 0 : i32
    %c0_i32_1 = arith.constant 0 : i32
    return %c0_i32, %c0_i32_0 : i32, i32
  }
  func.func @transform_2(%arg0: i32) -> (i32, i32) {
    %c0_i32 = arith.constant 0 : i32
    %c0_i32_0 = arith.constant 0 : i32
    %c0_i32_1 = arith.constant 0 : i32
    return %c0_i32, %c0_i32_0 : i32, i32
  }
  func.func @transform_3(%arg0: i32) -> (i32, i32) {
    %c0_i32 = arith.constant 0 : i32
    %c0_i32_0 = arith.constant 0 : i32
    %c0_i32_1 = arith.constant 0 : i32
    return %c0_i32, %c0_i32_0 : i32, i32
  }
  func.func @transform_4(%arg0: i32) -> (i32, i32) {
    %c0_i32 = arith.constant 0 : i32
    %c0_i32_0 = arith.constant 0 : i32
    %c0_i32_1 = arith.constant 0 : i32
    return %c0_i32, %c0_i32_0 : i32, i32
  }
  func.func @transform_5(%arg0: i32) -> (i32, i32) {
    %c0_i32 = arith.constant 0 : i32
    %c0_i32_0 = arith.constant 0 : i32
    %c0_i32_1 = arith.constant 0 : i32
    return %c0_i32, %c0_i32_0 : i32, i32
  }
  func.func @transform_6(%arg0: i32) -> (i32, i32) {
    %c0_i32 = arith.constant 0 : i32
    %c0_i32_0 = arith.constant 0 : i32
    %c0_i32_1 = arith.constant 0 : i32
    return %c0_i32, %c0_i32_0 : i32, i32
  }
  func.func @transform_7(%arg0: i32) -> (i32, i32) {
    %c0_i32 = arith.constant 0 : i32
    %c0_i32_0 = arith.constant 0 : i32
    return %arg0, %c0_i32 : i32, i32
  }
}

</mosaic_0001>

<bundles_post_ra>
// kernel: tpu_custom_call.1
= control target key start
LH: loop header
LB: loop body
LE: loop exit
PB: predicated region body
PF: predicated region fallthrough
CT: control target
= control target key end

     0   :  { %v387_v0 = vmov 0.0   ;;  %vm388_vm0 = vmmov 0   ;;  %vm42_vm1 = vcmask 261120   ;;  %vm219_vm2 = vcmask 130048   ;;  %s480_s1 = inlined_call_operand.vmem [shape: f32[32,32], index: 1, kind: input, shape index: {}]   ;;  %s481_s0 = inlined_call_operand.vmem [shape: f32[8,32], index: 0, kind: input, shape index: {}]   ;;  %s482_s3 = inlined_call_operand.vmem [shape: f32[32,16], index: 3, kind: input, shape index: {}]   ;;  %s483_s2 = inlined_call_operand.vmem [shape: f32[1,32], index: 2, kind: input, shape index: {}]   ;;  %s484_s5 = inlined_call_operand.vmem [shape: f32[16,1], index: 5, kind: input, shape index: {}]   ;;  %s485_s6 = inlined_call_operand.<no memory space> [shape: f32[1,1], index: 6, kind: input, shape index: {}]   ;;  %s486_s4 = inlined_call_operand.vmem [shape: f32[1,16], index: 4, kind: input, shape index: {}]   ;;  %s487_s7 = inlined_call_operand.vmem [shape: f32[8,2], index: 7, kind: output, shape index: {}]  }
   0x1   :  { %342 = vmatprep.subr.mxu0 %v387_v0  ;;  %v35_v1 = vld [vmem:[%s480_s1 + $0x18] sm:$0xff]  ;;  %v34_v2 = vld [vmem:[%s480_s1 + $0x10] sm:$0xff]  ;;  %350 = vmatprep.mubr.msk.f32.mxu0 %vm388_vm0, %v387_v0  ;;  %v33_v3 = vld [vmem:[%s480_s1 + $0x8] sm:$0xff]  ;;  %v12_v20 = vstv %s485_s6  ;;  %v389_v29 = vmov 0   ;;  %v299_v39 = vlaneseq  ;;  %vm314_vm4 = vcmask 15360  }
   0x2   :  { %343 = vmatpush3.msra.mxu0 %v35_v1  ;;  %353 = vmatprep.subr.mxu1 %v387_v0  ;;  %v32_v4 = vld [vmem:[%s480_s1] sm:$0xff]  ;;  %v125_v6 = vld [vmem:[%s482_s3 + $0x18] sm:$0xff]  ;;  %v124_v7 = vld [vmem:[%s482_s3 + $0x10] sm:$0xff]  ;;  %13 = vst [vmem:[#allocation2] sm:$0x1] %v12_v20 }
   0x3   :  { %344 = vmatprep.subr.mxu0 %v387_v0  ;;  %361 = vmatprep.mubr.msk.f32.mxu1 %vm388_vm0, %v387_v0  ;;  %v31_v5 = vld [vmem:[%s481_s0] sm:$0xff]  ;;  %v123_v8 = vld [vmem:[%s482_s3 + $0x8] sm:$0xff]  ;;  %v300_v40 = vand.u32 127, %v299_v39 }
   0x4   :  { %345 = vmatpush3.msra.mxu0 %v34_v2  ;;  %354 = vmatpush3.msra.mxu1 %v125_v6  ;;  %v122_v9 = vld [vmem:[%s482_s3] sm:$0xff]  ;;  %v212_v18 = vld [vmem:[%s484_s5 + $0x8] sm:$0xff] }
   0x5   :  { %346 = vmatprep.subr.mxu0 %v387_v0  ;;  %355 = vmatprep.subr.mxu1 %v387_v0  ;;  %v320_v10 = vld [vmem:[%s483_s2] ss:$0 sm:$0xff]  ;;  %vm301_vm3 = vcmp.eq.s32.totalorder %v300_v40, 1 }
   0x6   :  { %347 = vmatpush3.msra.mxu0 %v33_v3  ;;  %356 = vmatpush3.msra.mxu1 %v124_v7  ;;  %v211_v19 = vld [vmem:[%s484_s5] sm:$0xff] }
   0x7   :  { %348 = vmatprep.subr.mxu0 %v387_v0  ;;  %357 = vmatprep.subr.mxu1 %v387_v0  ;;  %v323_v21 = vld [vmem:[%s486_s4] ss:$0 sm:$0xff] }
   0x8   :  { %349 = vmatpush3.msra.mxu0 %v32_v4  ;;  %358 = vmatpush3.msra.mxu1 %v123_v8 }
   0x9   :  { %351 = vmatmul.mubr.msk.f32.vlgmr.msra.gmra.mxu0 %vm42_vm1, %v31_v5  ;;  %364 = vmatprep.subr.mxu0 %v387_v0  ;;  %v326_v30 = vld [vmem:[#allocation2] ss:$0 sm:$0xff] }
   0xa   :  { %368 = vmatprep.mubr.msk.f32.mxu0 %vm388_vm0, %v387_v0  ;;  %359 = vmatprep.subr.mxu1 %v387_v0 }
   0xb   :  { %360 = vmatpush3.msra.mxu1 %v122_v9  ;;  %365 = vmatpush3.msra.mxu0 %v212_v18 }
   0xc   :  { %366 = vmatprep.subr.mxu0 %v387_v0  ;;  %374 = vset.pattern.permute.xlu0 %v389_v29 }
   0xd   :  { %367 = vmatpush3.msra.mxu0 %v211_v19 }
  0xc9   :  { %v112_v11 = vpop.f32.mrf.mxu0 }
  0xca   :  { %v113_v12 = vadd.f32 %v320_v10, %v112_v11 }
  0xcb   :  { %v352_v13 = vpop.f32.mrf.mxu0 }
  0xcc   :  { %v322_v14 = vmul.f32 -1.442695, %v113_v12 }
  0xce   :  { %375 = vpow2.f32 %v322_v14 }
  0xdb   :  { %v376_v15 = vpop.eup %375 }
  0xdc   :  { %v119_v16 = vadd.f32 1.0, %v376_v15 }
  0xde   :  { %377 = vrcp.f32 %v119_v16 }
  0xeb   :  { %v378_v17 = vpop.eup %377 }
  0xec   :  { %362 = vmatmul.mubr.msk.f32.vlgmr.msra.gmra.mxu1 %vm42_vm1, %v378_v17 }
 0x1ac   :  { %v201_v22 = vpop.f32.mrf.mxu1 }
 0x1ad   :  { %v202_v23 = vadd.f32 %v323_v21, %v201_v22 }
 0x1ae   :  { %v363_v24 = vpop.f32.mrf.mxu1 }
 0x1af   :  { %v325_v25 = vmul.f32 -1.442695, %v202_v23 }
 0x1b1   :  { %379 = vpow2.f32 %v325_v25 }
 0x1be   :  { %v380_v26 = vpop.eup %379 }
 0x1bf   :  { %v208_v27 = vadd.f32 1.0, %v380_v26 }
 0x1c1   :  { %381 = vrcp.f32 %v208_v27 }
 0x1ce   :  { %v382_v28 = vpop.eup %381 }
 0x1cf   :  { %369 = vmatmul.mubr.msk.f32.vlgmr.msra.gmra.mxu0 %vm219_vm2, %v382_v28 }
 0x28f   :  { %v289_v31 = vpop.f32.mrf.mxu0 }
 0x290   :  { %v290_v32 = vadd.f32 %v326_v30, %v289_v31 }
 0x291   :  { %v370_v33 = vpop.f32.mrf.mxu0 }
 0x292   :  { %v328_v34 = vmul.f32 -1.442695, %v290_v32 }
 0x294   :  { %383 = vpow2.f32 %v328_v34 }
 0x2a1   :  { %v384_v35 = vpop.eup %383 }
 0x2a2   :  { %v296_v36 = vadd.f32 1.0, %v384_v35 }
 0x2a4   :  { %385 = vrcp.f32 %v296_v36 }
 0x2b1   :  { %v386_v37 = vpop.eup %385 }
 0x2b2   :  { %305 = vperm.xlu0 %374, %v386_v37   ;;  %v302_v38 = vsub.f32 1.0, %v386_v37 }
 0x2b6   :  { %310 = vperm.xlu0 %374, %v302_v38  }
 0x32d   :  { %v306_v41 = vpop.permute.xlu0 %305 }
 0x331   :  { %v311_v42 = vpop.permute.xlu0 %310 }
 0x332   :  { %v313_v43 = vsel %vm301_vm3, %v306_v41, %v311_v42 }
 0x333   :  { %315 = vst.msk [vmem:[%s487_s7] sm:$0xff] %vm314_vm4, %v313_v43 }

</bundles_post_ra>
